<compile_context>
chip_gen: v5e
topology: v5e:2x2
jax: 0.10.0
libtpu: 0.0.40
codegen_flags: <defaults>
</compile_context>

<pallas_src>
import functools
import math

import jax
import jax.numpy as jnp
from jax.experimental import pallas as pl
from jax.experimental.pallas import tpu as pltpu


# ---------------------------------------------------------------------------
# Tiling helpers
# ---------------------------------------------------------------------------

def _pick_tile(dim, target):
    """Largest 128-multiple tile <= target that divides `dim`, else full dim.
    # TODO(synk): add a padding path so awkward dims don't fall back to one
    # huge block."""
    t = (target // 128) * 128
    while t >= 128:
        if dim % t == 0:
            return t
        t -= 128
    return dim


def _heads_per_group(n_heads, d_k, d_v):
    """Smallest divisor of n_heads whose q/k and v group widths are 128-lane
    aligned; falls back to all heads (full-width block) otherwise."""
    for g in range(1, n_heads + 1):
        if n_heads % g:
            continue
        if (g * d_k) % 128 == 0 and (g * d_v) % 128 == 0:
            return g
    return n_heads


# ---------------------------------------------------------------------------
# Tiled matmul + bias kernel (used for Q/K/V/QKV and output projections)
# ---------------------------------------------------------------------------

def _matmul_bias_kernel(x_ref, w_ref, b_ref, o_ref, acc_ref, *, mxu_dtype):
    # x: (tm, tk)  w: (tk, tn)  b: (1, tn) f32  o: (tm, tn)  acc: (tm, tn) f32
    @pl.when(pl.program_id(2) == 0)
    def _():
        acc_ref[...] = jnp.zeros_like(acc_ref)

    acc_ref[...] += jnp.dot(
        x_ref[...].astype(mxu_dtype),
        w_ref[...].astype(mxu_dtype),
        preferred_element_type=jnp.float32,
    )

    @pl.when(pl.program_id(2) == pl.num_programs(2) - 1)
    def _():
        o_ref[...] = (acc_ref[...] + b_ref[...]).astype(o_ref.dtype)


def linear(x2d, w, b, *, mxu_dtype, out_dtype):
    """x2d: (M, Din), w: (Din, Dout), b: (Dout,) f32 -> (M, Dout) out_dtype."""
    M, Din = x2d.shape
    Dout = w.shape[1]
    tm = _pick_tile(M, 256)
    tn = _pick_tile(Dout, 512)
    tk = _pick_tile(Din, 1024)
    grid = (M // tm, Dout // tn, Din // tk)
    kernel = functools.partial(_matmul_bias_kernel, mxu_dtype=mxu_dtype)
    b2d = b.reshape(1, Dout).astype(jnp.float32)
    bytes_accessed = int(
        x2d.dtype.itemsize * M * Din * (Dout // tn)     # X re-read per n-block
        + w.dtype.itemsize * Din * Dout
        + 4 * Dout
        + jnp.dtype(out_dtype).itemsize * M * Dout)
    return pl.pallas_call(
        kernel,
        out_shape=jax.ShapeDtypeStruct((M, Dout), out_dtype),
        grid=grid,
        in_specs=[
            pl.BlockSpec((tm, tk), lambda i, j, kk: (i, kk)),
            pl.BlockSpec((tk, tn), lambda i, j, kk: (kk, j)),
            pl.BlockSpec((1, tn), lambda i, j, kk: (0, j)),
        ],
        out_specs=pl.BlockSpec((tm, tn), lambda i, j, kk: (i, j)),
        scratch_shapes=[pltpu.VMEM((tm, tn), jnp.float32)],
        compiler_params=pltpu.CompilerParams(
            dimension_semantics=("parallel", "parallel", "arbitrary"),
            vmem_limit_bytes=48 * 1024 * 1024),
        cost_estimate=pl.CostEstimate(
            flops=2 * M * Dout * Din, transcendentals=0,
            bytes_accessed=bytes_accessed),
    )(x2d, w, b2d)


# ---------------------------------------------------------------------------
# Flash-style attention kernel (online softmax over kv tiles)
# ---------------------------------------------------------------------------

def _flash_attn_kernel(q_ref, k_ref, v_ref, o_ref, m_ref, l_ref, acc_ref, *,
                       heads, d_k, d_v, mxu_dtype, approx_recip):
    # q_ref: (tq, heads*d_k)   k_ref: (tkv, heads*d_k)   v_ref: (tkv, heads*d_v)
    # o_ref: (tq, heads*d_v)
    # m_ref/l_ref: (heads, tq, 1) f32 scratch, acc_ref: (tq, heads*d_v) f32.
    ki = pl.program_id(3)

    @pl.when(ki == 0)
    def _():
        m_ref[...] = jnp.full_like(m_ref, -jnp.inf)
        l_ref[...] = jnp.zeros_like(l_ref)
        acc_ref[...] = jnp.zeros_like(acc_ref)

    tq = acc_ref.shape[0]
    q_full = q_ref[...]          # one full-width load per operand
    k_full = k_ref[...]
    v_full = v_ref[...]

    pv_parts, alpha_parts = [], []
    # Bounded unroll: `heads` = heads per lane-dense group (e.g. 4 at d=32).
    # TODO(synk): no attention mask / dropout in the original module; a mask
    # would be applied to `s` before the max/exp below.
    for h in range(heads):
        q = q_full[:, h * d_k:(h + 1) * d_k].astype(mxu_dtype)
        k = k_full[:, h * d_k:(h + 1) * d_k].astype(mxu_dtype)
        v = v_full[:, h * d_v:(h + 1) * d_v].astype(mxu_dtype)
        # QK^T by contracting the last dims of both operands (no in-kernel
        # transpose); 1/sqrt(d_k) was folded into Wq at prepare_params() time.
        s = jax.lax.dot_general(
            q, k, (((1,), (1,)), ((), ())),
            preferred_element_type=jnp.float32)          # (tq, tkv) f32
        m_prev = m_ref[h]                                # (tq, 1)
        m_new = jnp.maximum(m_prev, jnp.max(s, axis=-1, keepdims=True))
        alpha = jnp.exp(m_prev - m_new)
        p = jnp.exp(s - m_new)
        l_ref[h] = alpha * l_ref[h] + jnp.sum(p, axis=-1, keepdims=True)
        m_ref[h] = m_new
        pv_parts.append(jnp.dot(p.astype(mxu_dtype), v,
                                preferred_element_type=jnp.float32))
        alpha_parts.append(jnp.broadcast_to(alpha, (tq, d_v)))

    pv = pv_parts[0] if heads == 1 else jnp.concatenate(pv_parts, axis=-1)
    alpha = (alpha_parts[0] if heads == 1
             else jnp.concatenate(alpha_parts, axis=-1))
    # Full-width (lane-dense) accumulator read-modify-write.
    acc_ref[...] = alpha * acc_ref[...] + pv

    @pl.when(ki == pl.num_programs(3) - 1)
    def _():
        inv_parts = [
            jnp.broadcast_to(pl.reciprocal(l_ref[h], approx=approx_recip),
                             (tq, d_v))
            for h in range(heads)]
        inv = inv_parts[0] if heads == 1 else jnp.concatenate(inv_parts, -1)
        # Single lane-dense store of the whole head group.
        o_ref[...] = (acc_ref[...] * inv).astype(o_ref.dtype)


def flash_attention(q, k=None, v=None, *, n_heads, d_k, d_v, mxu_dtype,
                    out_dtype, approx_recip, fused=False,
                    tq_target=256, tkv_target=256):
    """Online-softmax attention over per-head-group column slices.

    fused=False: q,k,v are (N,Sq,H*d_k), (N,Skv,H*d_k), (N,Skv,H*d_v).
    fused=True : q is a single (N,S,2*H*d_k + H*d_v) fused-QKV buffer
                 (requires d_k == d_v); the q/k/v column sections are selected
                 via index-map offsets — no HBM reshuffle.
    Returns (N, Sq, H*d_v) in out_dtype, ready for the Wo projection.
    """
    N, Sq = q.shape[0], q.shape[1]
    Skv = Sq if fused else k.shape[1]
    G = _heads_per_group(n_heads, d_k, d_v)
    n_groups = n_heads // G
    Gk, Gv = G * d_k, G * d_v
    tq = _pick_tile(Sq, tq_target)
    tkv = _pick_tile(Skv, tkv_target)
    grid = (N, n_groups, Sq // tq, Skv // tkv)

    if fused:
        assert d_k == d_v and (Gk % 128 == 0)
        in_specs = [
            pl.BlockSpec((None, tq, Gk), lambda b, g, qi, ki: (b, qi, g)),
            pl.BlockSpec((None, tkv, Gk),
                         lambda b, g, qi, ki: (b, ki, n_groups + g)),
            pl.BlockSpec((None, tkv, Gv),
                         lambda b, g, qi, ki: (b, ki, 2 * n_groups + g)),
        ]
        args = (q, q, q)
    else:
        in_specs = [
            pl.BlockSpec((None, tq, Gk), lambda b, g, qi, ki: (b, qi, g)),
            pl.BlockSpec((None, tkv, Gk), lambda b, g, qi, ki: (b, ki, g)),
            pl.BlockSpec((None, tkv, Gv), lambda b, g, qi, ki: (b, ki, g)),
        ]
        args = (q, k, v)

    kernel = functools.partial(
        _flash_attn_kernel, heads=G, d_k=d_k, d_v=d_v,
        mxu_dtype=mxu_dtype, approx_recip=approx_recip)
    flops = 2 * N * n_heads * Sq * Skv * (d_k + d_v)
    bytes_accessed = int(
        q.dtype.itemsize * N * n_groups * (Sq // tq)
        * (tq * Gk + Skv * (Gk + Gv))
        + jnp.dtype(out_dtype).itemsize * N * Sq * n_heads * d_v)
    # TODO(synk): if per-tile K/V DMA latency is exposed behind short MXU
    # steps, add pipeline_mode=pl.Buffered(3) to the K/V BlockSpecs (re-check
    # against the 64 MiB v7x VMEM budget first).
    return pl.pallas_call(
        kernel,
        out_shape=jax.ShapeDtypeStruct((N, Sq, n_heads * d_v), out_dtype),
        grid=grid,
        in_specs=in_specs,
        out_specs=pl.BlockSpec((None, tq, Gv), lambda b, g, qi, ki: (b, qi, g)),
        scratch_shapes=[
            pltpu.VMEM((G, tq, 1), jnp.float32),   # running row max per head
            pltpu.VMEM((G, tq, 1), jnp.float32),   # running denominator
            pltpu.VMEM((tq, Gv), jnp.float32),     # output accumulator
        ],
        compiler_params=pltpu.CompilerParams(
            dimension_semantics=("parallel", "parallel", "parallel",
                                 "arbitrary"),
            vmem_limit_bytes=48 * 1024 * 1024),
        cost_estimate=pl.CostEstimate(
            flops=flops,
            transcendentals=N * n_heads * Sq * Skv,
            bytes_accessed=bytes_accessed),
    )(*args)


# ---------------------------------------------------------------------------
# Parameter preparation (done once, outside the per-call path)
# ---------------------------------------------------------------------------

def prepare_params(params, *, n_heads, d_k, d_v, mxu_dtype=jnp.bfloat16):
    """Fold 1/sqrt(d_k) into Wq/bq, pre-concatenate [Wq|Wk|Wv] for the fused
    self-attention projection, and cast weights to the MXU/storage dtype."""
    Wq, bq, Wk, bk, Wv, bv, Wo, bo = params
    scale = 1.0 / math.sqrt(d_k)
    Wq_s, bq_s = Wq * scale, bq * scale
    wdt = jnp.dtype(mxu_dtype)
    act_dtype = jnp.float32 if wdt == jnp.dtype(jnp.float32) else wdt
    return dict(
        mxu_dtype=wdt, act_dtype=act_dtype,
        approx_recip=(wdt != jnp.dtype(jnp.float32)),
        n_heads=n_heads, d_k=d_k, d_v=d_v,
        wq=Wq_s.astype(wdt), bq=bq_s.astype(jnp.float32),
        wk=Wk.astype(wdt), bk=bk.astype(jnp.float32),
        wv=Wv.astype(wdt), bv=bv.astype(jnp.float32),
        wo=Wo.astype(wdt), bo=bo.astype(jnp.float32),
        wqkv=jnp.concatenate([Wq_s, Wk, Wv], axis=1).astype(wdt),
        bqkv=jnp.concatenate([bq_s, bk, bv], axis=0).astype(jnp.float32),
    )


# ---------------------------------------------------------------------------
# Module wrapper
# ---------------------------------------------------------------------------

def multi_headed_attention(Q, K, V, prepared):
    N, S, D = Q.shape
    n_heads = prepared["n_heads"]
    d_k, d_v = prepared["d_k"], prepared["d_v"]
    mxu_dtype = prepared["mxu_dtype"]
    act_dtype = prepared["act_dtype"]
    approx_recip = prepared["approx_recip"]
    M = N * S

    G = _heads_per_group(n_heads, d_k, d_v)
    fused = (Q is K) and (K is V) and (d_k == d_v) and ((G * d_k) % 128 == 0)
    if fused:
        # Self-attention: one wide matmul for all three projections; the
        # attention kernel reads the q/k/v column sections in place.
        qkv = linear(Q.reshape(M, D), prepared["wqkv"], prepared["bqkv"],
                     mxu_dtype=mxu_dtype, out_dtype=act_dtype)
        qkv = qkv.reshape(N, S, 2 * n_heads * d_k + n_heads * d_v)
        attn = flash_attention(qkv, n_heads=n_heads, d_k=d_k, d_v=d_v,
                               mxu_dtype=mxu_dtype, out_dtype=act_dtype,
                               approx_recip=approx_recip, fused=True)
    else:
        q = linear(Q.reshape(M, D), prepared["wq"], prepared["bq"],
                   mxu_dtype=mxu_dtype,
                   out_dtype=act_dtype).reshape(N, S, n_heads * d_k)
        k = linear(K.reshape(K.shape[0] * K.shape[1], D), prepared["wk"],
                   prepared["bk"], mxu_dtype=mxu_dtype,
                   out_dtype=act_dtype).reshape(K.shape[0], K.shape[1],
                                                n_heads * d_k)
        v = linear(V.reshape(V.shape[0] * V.shape[1], D), prepared["wv"],
                   prepared["bv"], mxu_dtype=mxu_dtype,
                   out_dtype=act_dtype).reshape(V.shape[0], V.shape[1],
                                                n_heads * d_v)
        attn = flash_attention(q, k, v, n_heads=n_heads, d_k=d_k, d_v=d_v,
                               mxu_dtype=mxu_dtype, out_dtype=act_dtype,
                               approx_recip=approx_recip, fused=False)

    out = linear(attn.reshape(M, n_heads * d_v), prepared["wo"],
                 prepared["bo"], mxu_dtype=mxu_dtype, out_dtype=jnp.float32)
    return out.reshape(N, S, D)


# ---------------------------------------------------------------------------
# Params / reference
# ---------------------------------------------------------------------------

def init_params(key, dim_model, n_heads, d_k, d_v):
    ks = jax.random.split(key, 8)
    scale = 1.0 / math.sqrt(dim_model)

    def w(k, din, dout):
        return jax.random.uniform(k, (din, dout), jnp.float32, -scale, scale)

    def b(k, dout):
        return jax.random.uniform(k, (dout,), jnp.float32, -scale, scale)

    Wq = w(ks[0], dim_model, d_k * n_heads); bq = b(ks[1], d_k * n_heads)
    Wk = w(ks[2], dim_model, d_k * n_heads); bk = b(ks[3], d_k * n_heads)
    Wv = w(ks[4], dim_model, d_v * n_heads); bv = b(ks[5], d_v * n_heads)
    Wo = w(ks[6], dim_model, dim_model);     bo = b(ks[7], dim_model)
    return (Wq, bq, Wk, bk, Wv, bv, Wo, bo)


def reference(Q, K, V, params, *, n_heads, d_k, d_v):
    """Pure-JAX reference mirroring the PyTorch forward exactly."""
    N, S, D = Q.shape
    Wq, bq, Wk, bk, Wv, bv, Wo, bo = params
    q = (Q @ Wq + bq).reshape(N, S, n_heads, d_k).transpose(0, 2, 1, 3)
    k = (K @ Wk + bk).reshape(N, S, n_heads, d_k).transpose(0, 2, 1, 3)
    v = (V @ Wv + bv).reshape(N, S, n_heads, d_v).transpose(0, 2, 1, 3)
    s = jnp.einsum("nhqd,nhkd->nhqk", q, k) / jnp.sqrt(jnp.float32(d_k))
    w = jax.nn.softmax(s, axis=-1)
    a = jnp.einsum("nhqk,nhkd->nhqd", w, v)
    a = a.transpose(0, 2, 1, 3).reshape(N, S, n_heads * d_v)
    return a @ Wo + bo


if __name__ == "__main__":
    # Small shapes consistent with the module (dim_model divisible by n_heads).
    batch, seq, n_heads, dim_model = 2, 8, 4, 128
    d_k = dim_model // n_heads
    d_v = dim_model // n_heads

    key = jax.random.PRNGKey(0)
    kq, kk, kv, kp = jax.random.split(key, 4)
    Q = jax.random.normal(kq, (batch, seq, dim_model), jnp.float32)
    K = jax.random.normal(kk, (batch, seq, dim_model), jnp.float32)
    V = jax.random.normal(kv, (batch, seq, dim_model), jnp.float32)
    params = init_params(kp, dim_model, n_heads, d_k, d_v)

    # 1) Cross-attention path: three projections, f32 everywhere (precise).
    prep_f32 = prepare_params(params, n_heads=n_heads, d_k=d_k, d_v=d_v,
                              mxu_dtype=jnp.float32)
    out = multi_headed_attention(Q, K, V, prep_f32)
    out = jax.block_until_ready(out)
    ref = reference(Q, K, V, params, n_heads=n_heads, d_k=d_k, d_v=d_v)
    assert out.shape == (batch, seq, dim_model)
    assert jnp.allclose(out, ref, atol=5e-3, rtol=5e-3), \
        float(jnp.max(jnp.abs(out - ref)))

    # 2) Self-attention path: fused QKV projection, bf16 weights/activations
    #    in HBM, bf16 MXU operands, f32 accumulation (default fast mode).
    prep_bf16 = prepare_params(params, n_heads=n_heads, d_k=d_k, d_v=d_v,
                               mxu_dtype=jnp.bfloat16)
    out_sa = multi_headed_attention(Q, Q, Q, prep_bf16)
    out_sa = jax.block_until_ready(out_sa)
    ref_sa = reference(Q, Q, Q, params, n_heads=n_heads, d_k=d_k, d_v=d_v)
    assert out_sa.shape == (batch, seq, dim_model)
    assert jnp.allclose(out_sa, ref_sa, atol=7.5e-2, rtol=7.5e-2), \
        float(jnp.max(jnp.abs(out_sa - ref_sa)))

    print("KERNEL_OK")
</pallas_src>

<mosaic_0001>
module attributes {stable_mosaic.version = 11 : i64} {
  func.func @_matmul_bias_kernel(%arg0: i32, %arg1: i32, %arg2: i32, %arg3: memref<16x128xf32, #tpu.memory_space<vmem>>, %arg4: memref<128x128xf32, #tpu.memory_space<vmem>>, %arg5: memref<1x128xf32, #tpu.memory_space<vmem>>, %arg6: memref<16x128xf32, #tpu.memory_space<vmem>>, %arg7: memref<16x128xf32, #tpu.memory_space<vmem>>) attributes {dimension_semantics = [#tpu.dimension_semantics<parallel>, #tpu.dimension_semantics<parallel>, #tpu.dimension_semantics<arbitrary>], iteration_bounds = array<i64: 1, 1, 1>, scalar_prefetch = 0 : i64, scratch_operands = 1 : i64, tpu.core_type = #tpu.core_type<tc>, window_params = [{transform_indices = @transform_0, window_bounds = array<i64: 16, 128>}, {transform_indices = @transform_1, window_bounds = array<i64: 128, 128>}, {transform_indices = @transform_2, window_bounds = array<i64: 1, 128>}, {transform_indices = @transform_3, window_bounds = array<i64: 16, 128>}]} {
    %c0_i32 = arith.constant 0 : i32
    %0 = arith.cmpi eq, %arg2, %c0_i32 : i32
    %1 = arith.extui %0 : i1 to i32
    %c0_i32_0 = arith.constant 0 : i32
    %2 = arith.cmpi ne, %1, %c0_i32_0 : i32
    scf.if %2 {
      %cst_10 = arith.constant 0.000000e+00 : f32
      %12 = vector.broadcast %cst_10 : f32 to vector<16x128xf32>
      %c0_11 = arith.constant 0 : index
      %c0_12 = arith.constant 0 : index
      %13 = vector.load %arg7[%c0_11, %c0_12] : memref<16x128xf32, #tpu.memory_space<vmem>>, vector<16x128xf32>
      tpu.vector_store %arg7[%c0_11, %c0_12], %12 {strides = array<i32>} : memref<16x128xf32, #tpu.memory_space<vmem>>, vector<16x128xf32>,
    } else {
    }
    %c0 = arith.constant 0 : index
    %c0_1 = arith.constant 0 : index
    %3 = vector.load %arg7[%c0, %c0_1] : memref<16x128xf32, #tpu.memory_space<vmem>>, vector<16x128xf32>
    %c0_2 = arith.constant 0 : index
    %c0_3 = arith.constant 0 : index
    %4 = vector.load %arg3[%c0_2, %c0_3] : memref<16x128xf32, #tpu.memory_space<vmem>>, vector<16x128xf32>
    %c0_4 = arith.constant 0 : index
    %c0_5 = arith.constant 0 : index
    %5 = vector.load %arg4[%c0_4, %c0_5] : memref<128x128xf32, #tpu.memory_space<vmem>>, vector<128x128xf32>
    %cst = arith.constant dense<0.000000e+00> : vector<16x128xf32>
    %6 = tpu.matmul %4, %5, %cst {dimension_numbers = #tpu.dot_dimension_numbers<[1], [0], [0], [1], [0, 0, 1, 1], [], []>} : vector<16x128xf32>, vector<128x128xf32>, vector<16x128xf32> -> vector<16x128xf32>
    %7 = arith.addf %3, %6 : vector<16x128xf32>
    %c0_6 = arith.constant 0 : index
    %c0_7 = arith.constant 0 : index
    %8 = vector.load %arg7[%c0_6, %c0_7] : memref<16x128xf32, #tpu.memory_space<vmem>>, vector<16x128xf32>
    tpu.vector_store %arg7[%c0_6, %c0_7], %7 {strides = array<i32>} : memref<16x128xf32, #tpu.memory_space<vmem>>, vector<16x128xf32>,
    %c0_i32_8 = arith.constant 0 : i32
    %9 = arith.cmpi eq, %arg2, %c0_i32_8 : i32
    %10 = arith.extui %9 : i1 to i32
    %c0_i32_9 = arith.constant 0 : i32
    %11 = arith.cmpi ne, %10, %c0_i32_9 : i32
    scf.if %11 {
      %c0_10 = arith.constant 0 : index
      %c0_11 = arith.constant 0 : index
      %12 = vector.load %arg7[%c0_10, %c0_11] : memref<16x128xf32, #tpu.memory_space<vmem>>, vector<16x128xf32>
      %c0_12 = arith.constant 0 : index
      %c0_13 = arith.constant 0 : index
      %13 = vector.load %arg5[%c0_12, %c0_13] : memref<1x128xf32, #tpu.memory_space<vmem>>, vector<1x128xf32>
      %14 = vector.broadcast %13 : vector<1x128xf32> to vector<16x128xf32>
      %15 = arith.addf %12, %14 : vector<16x128xf32>
      %c0_14 = arith.constant 0 : index
      %c0_15 = arith.constant 0 : index
      %16 = vector.load %arg6[%c0_14, %c0_15] : memref<16x128xf32, #tpu.memory_space<vmem>>, vector<16x128xf32>
      tpu.vector_store %arg6[%c0_14, %c0_15], %15 {strides = array<i32>} : memref<16x128xf32, #tpu.memory_space<vmem>>, vector<16x128xf32>,
    } else {
    }
    return
  }
  func.func @transform_0(%arg0: i32, %arg1: i32, %arg2: i32) -> (i32, i32) {
    %c0_i32 = arith.constant 0 : i32
    return %arg0, %arg2 : i32, i32
  }
  func.func @transform_1(%arg0: i32, %arg1: i32, %arg2: i32) -> (i32, i32) {
    %c0_i32 = arith.constant 0 : i32
    return %arg2, %arg1 : i32, i32
  }
  func.func @transform_2(%arg0: i32, %arg1: i32, %arg2: i32) -> (i32, i32) {
    %c0_i32 = arith.constant 0 : i32
    %c0_i32_0 = arith.constant 0 : i32
    return %c0_i32, %arg1 : i32, i32
  }
  func.func @transform_3(%arg0: i32, %arg1: i32, %arg2: i32) -> (i32, i32) {
    %c0_i32 = arith.constant 0 : i32
    return %arg0, %arg1 : i32, i32
  }
}

</mosaic_0001>

<bundles_post_ra>
// kernel: tpu_custom_call.1
= control target key start
LH: loop header
LB: loop body
LE: loop exit
PB: predicated region body
PF: predicated region fallthrough
CT: control target
= control target key end

     0   :  { %8 = vsyncpa [#allocation4], 0  ;;  %s279_s0 = inlined_call_operand.hbm [shape: f32[16,128], index: 0, kind: input, shape index: {}]   ;;  %s280_s1 = inlined_call_operand.hbm [shape: f32[128,128], index: 1, kind: input, shape index: {}]   ;;  %s281_s2 = inlined_call_operand.vmem [shape: f32[1,128], index: 2, kind: input, shape index: {}]   ;;  %s282_s3 = inlined_call_operand.hbm [shape: f32[16,128], index: 3, kind: output, shape index: {}]  }
   0x1   :  { %9 = vsyncpa [#allocation7], 0 }
   0x2   :  { %10 = vsyncpa [#allocation5], 0  ;;  %s15_s14 = sshll.u32 %s279_s0, 4  ;;  %s233_s15 = smov [#allocation3]   ;;  %s16_s14 = int_to_ptr.hbm [resolvable:$true] %s15_s14 }
   0x3   :  { %s17_s16 = sshll.u32 %s233_s15, 4  ;;  %s28_s19 = sshll.u32 %s280_s1, 4  ;;  %s18_s16 = int_to_ptr.vmem [resolvable:$true] %s17_s16  ;;  %s29_s19 = int_to_ptr.hbm [resolvable:$true] %s28_s19 }
   0x4   :  { %s234_s20 = smov 128   ;;  %s235_s21 = smov 8  }
   0x5   :  { %23 = dma.hbm_to_vmem [thread:$0]  %s16_s14, 256, %s18_s16, [#allocation4], %s234_s20, %s234_s20, %s235_s21  }
   0x6   :  { %s236_s22 = smov [#allocation6]  }
   0x7   :  { %s30_s23 = sshll.u32 %s236_s22, 4  ;;  %s31_s23 = int_to_ptr.vmem [resolvable:$true] %s30_s23 }
   0x8   :  { %36 = dma.hbm_to_vmem [thread:$0]  %s29_s19, 2048, %s31_s23, [#allocation7], %s234_s20, %s234_s20, %s235_s21  }
   0x9   :  { %227 = dma.done.wait [#allocation4], 256  }
   0xa   :  { %228 = vsyncadd [#allocation4], 4294967040 }
   0xb   :  { %229 = dma.done.wait [#allocation7], 2048  }
   0xc   :  { %230 = vsyncadd [#allocation7], 4294965248  ;;  %v72_v0 = vld [vmem:[#allocation6 + $0x78] sm:$0xff]  ;;  %v71_v1 = vld [vmem:[#allocation6 + $0x70] sm:$0xff]  ;;  %s237_s24 = smov [#allocation8]   ;;  %s119_s28 = sshll.u32 %s282_s3, 4  ;;  %s120_s28 = int_to_ptr.hbm [resolvable:$true] %s119_s28 }
   0xd   :  { %73 = vmatpush.msra.mxu0 %v72_v0  ;;  %133 = vmatpush.msra.mxu1 %v72_v0  ;;  %v70_v2 = vld [vmem:[#allocation6 + $0x68] sm:$0xff]  ;;  %v69_v3 = vld [vmem:[#allocation6 + $0x60] sm:$0xff]  ;;  %v68_v4 = vld [vmem:[#allocation6 + $0x58] sm:$0xff]  ;;  %s117_s25 = sshll.u32 %s237_s24, 4  ;;  %s118_s25 = int_to_ptr.vmem [resolvable:$true] %s117_s25 }
   0xe   :  { %v67_v5 = vld [vmem:[#allocation6 + $0x50] sm:$0xff]  ;;  %v66_v6 = vld [vmem:[#allocation6 + $0x48] sm:$0xff]  ;;  %v65_v7 = vld [vmem:[#allocation6 + $0x40] sm:$0xff] }
   0xf   :  { %74 = vmatpush.msra.mxu0 %v71_v1  ;;  %134 = vmatpush.msra.mxu1 %v71_v1  ;;  %v64_v8 = vld [vmem:[#allocation6 + $0x38] sm:$0xff]  ;;  %v63_v9 = vld [vmem:[#allocation6 + $0x30] sm:$0xff]  ;;  %v62_v10 = vld [vmem:[#allocation6 + $0x28] sm:$0xff] }
  0x10   :  { %v61_v11 = vld [vmem:[#allocation6 + $0x20] sm:$0xff]  ;;  %v60_v12 = vld [vmem:[#allocation6 + $0x18] sm:$0xff]  ;;  %v59_v13 = vld [vmem:[#allocation6 + $0x10] sm:$0xff] }
  0x11   :  { %75 = vmatpush.msra.mxu0 %v70_v2  ;;  %135 = vmatpush.msra.mxu1 %v70_v2  ;;  %v58_v14 = vld [vmem:[#allocation6 + $0x8] sm:$0xff]  ;;  %v57_v15 = vld [vmem:[#allocation6] sm:$0xff]  ;;  %v55_v16 = vld [vmem:[#allocation3] sm:$0xff] }
  0x12   :  { %v56_v17 = vld [vmem:[#allocation3 + $0x8] sm:$0xff]  ;;  %v154_v18 = vld [vmem:[%s281_s2] ss:$0 sm:$0xff] }
  0x13   :  { %76 = vmatpush.msra.mxu0 %v69_v3  ;;  %136 = vmatpush.msra.mxu1 %v69_v3 }
  0x15   :  { %77 = vmatpush.msra.mxu0 %v68_v4  ;;  %137 = vmatpush.msra.mxu1 %v68_v4 }
  0x17   :  { %78 = vmatpush.msra.mxu0 %v67_v5  ;;  %138 = vmatpush.msra.mxu1 %v67_v5 }
  0x19   :  { %79 = vmatpush.msra.mxu0 %v66_v6  ;;  %139 = vmatpush.msra.mxu1 %v66_v6 }
  0x1b   :  { %80 = vmatpush.msra.mxu0 %v65_v7  ;;  %140 = vmatpush.msra.mxu1 %v65_v7 }
  0x1d   :  { %81 = vmatpush.msra.mxu0 %v64_v8  ;;  %141 = vmatpush.msra.mxu1 %v64_v8 }
  0x1f   :  { %82 = vmatpush.msra.mxu0 %v63_v9  ;;  %142 = vmatpush.msra.mxu1 %v63_v9 }
  0x21   :  { %83 = vmatpush.msra.mxu0 %v62_v10  ;;  %143 = vmatpush.msra.mxu1 %v62_v10 }
  0x23   :  { %84 = vmatpush.msra.mxu0 %v61_v11  ;;  %144 = vmatpush.msra.mxu1 %v61_v11 }
  0x25   :  { %85 = vmatpush.msra.mxu0 %v60_v12  ;;  %145 = vmatpush.msra.mxu1 %v60_v12 }
  0x27   :  { %86 = vmatpush.msra.mxu0 %v59_v13  ;;  %146 = vmatpush.msra.mxu1 %v59_v13 }
  0x29   :  { %87 = vmatpush.msra.mxu0 %v58_v14  ;;  %147 = vmatpush.msra.mxu1 %v58_v14 }
  0x2b   :  { %88 = vmatpush.msra.mxu0 %v57_v15  ;;  %148 = vmatpush.msra.mxu1 %v57_v15 }
  0x2c   :  { %89 = vmatmul.f32.vlgmr.msra.gmra.mxu0 %v55_v16  ;;  %92 = vmatmul.f32.vlgmr.msra.gmra.mxu1 %v56_v17 }
  0xa9   :  { %v90_v19 = vpop.f32.mrf.mxu0  ;;  %v93_v20 = vpop.f32.mrf.mxu1 }
  0xaa   :  { %v109_v21 = vadd.f32 %v154_v18, %v90_v19  ;;  %v110_v22 = vadd.f32 %v154_v18, %v93_v20 }
  0xac   :  { %111 = vst [vmem:[#allocation8] sm:$0xff] %v109_v21 }
  0xad   :  { %112 = vst [vmem:[#allocation8 + $0x8] sm:$0xff] %v110_v22 }
  0xae   :  { %125 = dma.vmem_to_hbm [thread:$0]  %s118_s25, 256, %s120_s28, [#allocation5], %s234_s20, %s234_s20, %s235_s21  }
  0xaf   :  { %231 = dma.done.wait [#allocation5], 256  }
  0xb0   :  { %232 = vsyncadd [#allocation5], 4294967040 }
  0xb1   :  { %130 = vsyncpa [#allocation4], 1 }
  0xb2   :  { %131 = vsyncpa [#allocation7], 1 }
  0xb3   :  { %132 = vsyncpa [#allocation5], 1 }

</bundles_post_ra>
